<compile_context>
chip_gen: v6e
topology: v6e:2x2x1
jax: 0.10.0
libtpu: 0.0.40
codegen_flags: <defaults>
</compile_context>

<pallas_src>
import functools

import jax
import jax.numpy as jnp
from jax.experimental import pallas as pl
from jax.experimental.pallas import tpu as pltpu


def _round_up(x, m):
    return (x + m - 1) // m * m


def _patch_embed_kernel(p_ref, w_ref, b_ref, o_ref):
    # p_ref: (TM, K)  compute-dtype patch-row tile (double-buffered)
    # w_ref: (K, E)   compute-dtype flattened conv weight (VMEM-resident, 1 buf)
    # b_ref: (1, E)   f32 bias (VMEM-resident, 1 buf)
    # o_ref: (TM, E)  output tile
    acc = jnp.dot(p_ref[...], w_ref[...], preferred_element_type=jnp.float32)
    o_ref[...] = (acc + b_ref[...]).astype(o_ref.dtype)


@functools.partial(
    jax.jit, static_argnames=("patch_size", "compute_dtype", "out_dtype", "tm"))
def patch_embed(x, weight, bias, *, patch_size, compute_dtype=jnp.bfloat16,
                out_dtype=None, tm=1024):
    """x: (B, C, H, W); weight: (E, C, ph, pw); bias: (E,) -> (B, N, E)."""
    B, C, H, W = x.shape
    E = weight.shape[0]
    ph = pw = patch_size
    # PyTorch PatchEmbed asserts exact divisibility; mirror that.
    assert H % ph == 0 and W % pw == 0, "image size must be divisible by patch size"
    gh, gw = H // ph, W // pw
    N = gh * gw
    K = C * ph * pw
    M = B * N
    out_dtype = jnp.dtype(x.dtype if out_dtype is None else out_dtype)

    # Cast before the patch-extraction transpose so the glue moves half the
    # bytes; the allow_input_fusion hint below lets XLA fold it into the
    # patches input DMA.
    # TODO(synk): if xprof shows a separate transpose fusion feeding the
    # pallas_call (i.e. the fusion hint did not fire), move patch extraction
    # into the kernel: grid over (B, gh) with (1, C, ph, W) input blocks and
    # do the (C, ph, pw)->K relayout in VMEM (XLU work, hidden under MXU).
    x_c = x.astype(compute_dtype)

    # Patch extraction: (B, C, H, W) -> (B*N, K), K ordered (C, ph, pw) to
    # match weight.reshape(E, K).
    patches = x_c.reshape(B, C, gh, ph, gw, pw)
    patches = patches.transpose(0, 2, 4, 1, 3, 5).reshape(M, K)

    w_flat = weight.reshape(E, K).T.astype(compute_dtype)   # (K, E)
    b_flat = bias.reshape(1, E).astype(jnp.float32)

    # Row tile.  No M padding: the partial last block is masked on store.
    # (On v7x keep the grid >= ~8 row tiles so the two TensorCores balance.)
    TM = min(tm, _round_up(M, 8))
    grid = (pl.cdiv(M, TM),)

    cbytes = jnp.dtype(compute_dtype).itemsize
    obytes = out_dtype.itemsize
    # VMEM: double-buffered patch/output tiles + single-buffered weight/bias.
    vmem_est = (2 * TM * K * cbytes          # patch tiles
                + K * E * cbytes             # weight (resident, 1 buffer)
                + E * 4                      # bias
                + 2 * TM * E * obytes)       # output tiles
    vmem_limit = max(16 << 20, min(int(vmem_est * 3 // 2) + (2 << 20), 48 << 20))

    cost = pl.CostEstimate(
        flops=2 * M * K * E,
        transcendentals=0,
        bytes_accessed=M * K * cbytes + K * E * cbytes + E * 4 + M * E * obytes,
    )

    resident = pl.Buffered(1)   # grid-invariant operands: single buffer
    out = pl.pallas_call(
        _patch_embed_kernel,
        out_shape=jax.ShapeDtypeStruct((M, E), out_dtype),
        grid_spec=pltpu.PrefetchScalarGridSpec(
            num_scalar_prefetch=0,
            grid=grid,
            in_specs=[
                pl.BlockSpec((TM, K), lambda i: (i, 0)),    # tiled over rows
                pl.BlockSpec((K, E), lambda i: (0, 0), pipeline_mode=resident),
                pl.BlockSpec((1, E), lambda i: (0, 0), pipeline_mode=resident),
            ],
            out_specs=pl.BlockSpec((TM, E), lambda i: (i, 0)),
        ),
        compiler_params=pltpu.CompilerParams(
            # Row tiles are independent -> shard across TensorCores on v7x
            # (no-op on single-core v5e/v6e).
            dimension_semantics=("parallel",),
            # Let the patch-extraction glue fuse into the patches input DMA.
            allow_input_fusion=[True, False, False],
            vmem_limit_bytes=vmem_limit,
        ),
        cost_estimate=cost,
    )(patches, w_flat, b_flat)

    return out.reshape(B, N, E)


if __name__ == "__main__":
    # Small, shape-consistent config: img=16, patch=8 -> 2x2 = 4 patches.
    B, C, IMG, PATCH, EMBED = 2, 4, 16, 8, 128

    key = jax.random.PRNGKey(0)
    kx, kw, kb = jax.random.split(key, 3)
    x = jax.random.normal(kx, (B, C, IMG, IMG), dtype=jnp.float32)
    weight = jax.random.normal(kw, (EMBED, C, PATCH, PATCH), dtype=jnp.float32) * 0.02
    bias = jax.random.normal(kb, (EMBED,), dtype=jnp.float32) * 0.02

    out = patch_embed(x, weight, bias, patch_size=PATCH)
    out = jax.block_until_ready(out)

    # Reference: strided conv (== nn.Conv2d(kernel=stride=patch)) then
    # flatten(2).transpose(1, 2), computed in f32.
    ref = jax.lax.conv_general_dilated(
        x, weight, window_strides=(PATCH, PATCH), padding="VALID",
        dimension_numbers=("NCHW", "OIHW", "NCHW"))
    ref = ref + bias[None, :, None, None]
    ref = ref.reshape(B, EMBED, -1).transpose(0, 2, 1)

    N = (IMG // PATCH) ** 2
    assert out.shape == (B, N, EMBED), out.shape
    assert out.dtype == x.dtype, out.dtype
    # Kernel runs the matmul in bf16 with f32 accumulation -> compare against
    # the f32 conv reference with a bf16-appropriate tolerance.
    err = float(jnp.max(jnp.abs(out - ref)))
    assert jnp.allclose(out, ref, atol=2e-2, rtol=2e-2), err

    # bf16-output path (the byte-saving option recommended for v6e/v7x).
    out_bf16 = patch_embed(x, weight, bias, patch_size=PATCH,
                           out_dtype=jnp.bfloat16)
    out_bf16 = jax.block_until_ready(out_bf16)
    assert out_bf16.shape == (B, N, EMBED), out_bf16.shape
    assert out_bf16.dtype == jnp.bfloat16, out_bf16.dtype
    err_bf16 = float(jnp.max(jnp.abs(out_bf16.astype(jnp.float32) - ref)))
    assert jnp.allclose(out_bf16.astype(jnp.float32), ref,
                        atol=3e-2, rtol=3e-2), err_bf16

    print("KERNEL_OK")
</pallas_src>

<mosaic_0001>
module attributes {stable_mosaic.version = 11 : i64} {
  func.func @_patch_embed_kernel(%arg0: i32, %arg1: memref<8x256xbf16, #tpu.memory_space<vmem>>, %arg2: memref<256x128xbf16, #tpu.memory_space<vmem>>, %arg3: memref<1x128xf32, #tpu.memory_space<vmem>>, %arg4: memref<8x128xf32, #tpu.memory_space<vmem>>) attributes {dimension_semantics = [#tpu.dimension_semantics<parallel>], iteration_bounds = array<i64: 1>, scalar_prefetch = 0 : i64, scratch_operands = 0 : i64, tpu.core_type = #tpu.core_type<tc>, window_params = [{transform_indices = @transform_0, window_bounds = array<i64: 8, 256>}, {pipeline_mode = #tpu.pipeline_mode<synchronous>, transform_indices = @transform_1, window_bounds = array<i64: 256, 128>}, {pipeline_mode = #tpu.pipeline_mode<synchronous>, transform_indices = @transform_2, window_bounds = array<i64: 1, 128>}, {transform_indices = @transform_3, window_bounds = array<i64: 8, 128>}]} {
    %c0 = arith.constant 0 : index
    %c0_0 = arith.constant 0 : index
    %0 = vector.load %arg1[%c0, %c0_0] : memref<8x256xbf16, #tpu.memory_space<vmem>>, vector<8x256xbf16>
    %c0_1 = arith.constant 0 : index
    %c0_2 = arith.constant 0 : index
    %1 = vector.load %arg2[%c0_1, %c0_2] : memref<256x128xbf16, #tpu.memory_space<vmem>>, vector<256x128xbf16>
    %cst = arith.constant dense<0.000000e+00> : vector<8x128xf32>
    %2 = tpu.matmul %0, %1, %cst {dimension_numbers = #tpu.dot_dimension_numbers<[1], [0], [0], [1], [0, 0, 1, 1], [], []>} : vector<8x256xbf16>, vector<256x128xbf16>, vector<8x128xf32> -> vector<8x128xf32>
    %c0_3 = arith.constant 0 : index
    %c0_4 = arith.constant 0 : index
    %3 = vector.load %arg3[%c0_3, %c0_4] : memref<1x128xf32, #tpu.memory_space<vmem>>, vector<1x128xf32>
    %4 = vector.broadcast %3 : vector<1x128xf32> to vector<8x128xf32>
    %5 = arith.addf %2, %4 : vector<8x128xf32>
    %c0_5 = arith.constant 0 : index
    %c0_6 = arith.constant 0 : index
    %6 = vector.load %arg4[%c0_5, %c0_6] : memref<8x128xf32, #tpu.memory_space<vmem>>, vector<8x128xf32>
    tpu.vector_store %arg4[%c0_5, %c0_6], %5 {strides = array<i32>} : memref<8x128xf32, #tpu.memory_space<vmem>>, vector<8x128xf32>,
    return
  }
  func.func @transform_0(%arg0: i32) -> (i32, i32) {
    %c0_i32 = arith.constant 0 : i32
    %c0_i32_0 = arith.constant 0 : i32
    return %arg0, %c0_i32 : i32, i32
  }
  func.func @transform_1(%arg0: i32) -> (i32, i32) {
    %c0_i32 = arith.constant 0 : i32
    %c0_i32_0 = arith.constant 0 : i32
    %c0_i32_1 = arith.constant 0 : i32
    return %c0_i32, %c0_i32_0 : i32, i32
  }
  func.func @transform_2(%arg0: i32) -> (i32, i32) {
    %c0_i32 = arith.constant 0 : i32
    %c0_i32_0 = arith.constant 0 : i32
    %c0_i32_1 = arith.constant 0 : i32
    return %c0_i32, %c0_i32_0 : i32, i32
  }
  func.func @transform_3(%arg0: i32) -> (i32, i32) {
    %c0_i32 = arith.constant 0 : i32
    %c0_i32_0 = arith.constant 0 : i32
    return %arg0, %c0_i32 : i32, i32
  }
}

</mosaic_0001>

<bundles_post_ra>
// kernel: patch_embed.1
= control target key start
LH: loop header
LB: loop body
LE: loop exit
PB: predicated region body
PF: predicated region fallthrough
CT: control target
= control target key end

     0   :  { %s374_s0 = inlined_call_operand.vmem [shape: bf16[8,256], index: 0, kind: input, shape index: {}]   ;;  %s375_s1 = inlined_call_operand.vmem [shape: bf16[256,128], index: 1, kind: input, shape index: {}]   ;;  %s376_s2 = inlined_call_operand.vmem [shape: f32[1,128], index: 2, kind: input, shape index: {}]   ;;  %s377_s3 = inlined_call_operand.hbm [shape: f32[8,128], index: 3, kind: output, shape index: {}]  }
   0x1   :  { %v256_v0 = vld [vmem:[%s375_s1 + $0x78] sm:$0xff]   ;;  %v258_v2 = vld [vmem:[%s375_s1 + $0x70] sm:$0xff]   ;;  %v260_v4 = vld [vmem:[%s375_s1 + $0x68] sm:$0xff]  }
   0x2   :  { %v257_v1 = vld [vmem:[%s375_s1 + $0x38] sm:$0xff]   ;;  %233 = vmatprep.subr.bf16.mxu0 %v256_v0  ;;  %v259_v3 = vld [vmem:[%s375_s1 + $0x30] sm:$0xff]   ;;  %v261_v5 = vld [vmem:[%s375_s1 + $0x28] sm:$0xff]  }
   0x3   :  { %234 = vmatpush3.bf16.msra.mxu0 %v257_v1  ;;  %v262_v6 = vld [vmem:[%s375_s1 + $0x60] sm:$0xff]   ;;  %v264_v8 = vld [vmem:[%s375_s1 + $0x58] sm:$0xff]   ;;  %v266_v10 = vld [vmem:[%s375_s1 + $0x50] sm:$0xff]  }
   0x4   :  { %235 = vmatprep.subr.bf16.mxu0 %v258_v2  ;;  %v263_v7 = vld [vmem:[%s375_s1 + $0x20] sm:$0xff]   ;;  %v265_v9 = vld [vmem:[%s375_s1 + $0x18] sm:$0xff]  }
   0x5   :  { %v16_v11 = vld [vmem:[%s374_s0] sm:$0xff] }
   0x7   :  { %236 = vmatpush3.bf16.msra.mxu0 %v259_v3 }
   0x8   :  { %237 = vmatprep.subr.bf16.mxu0 %v260_v4 }
   0xb   :  { %238 = vmatpush3.bf16.msra.mxu0 %v261_v5 }
   0xc   :  { %239 = vmatprep.subr.bf16.mxu0 %v262_v6 }
   0xf   :  { %240 = vmatpush3.bf16.msra.mxu0 %v263_v7 }
  0x10   :  { %241 = vmatprep.subr.bf16.mxu0 %v264_v8 }
  0x11   :  { %8 = vsyncpa [#allocation3], 0  ;;  %v216_v12 = vcombine.high %v16_v11, %v16_v11  ;;  %v267_v13 = vld [vmem:[%s375_s1 + $0x10] sm:$0xff]   ;;  %v268_v14 = vld [vmem:[%s375_s1 + $0x48] sm:$0xff]   ;;  %v215_v18 = vcombine.low %v16_v11, %v16_v11  ;;  %s296_s20 = smov [#allocation2]  }
  0x12   :  { %v269_v15 = vld [vmem:[%s375_s1 + $0x8] sm:$0xff]   ;;  %v270_v16 = vld [vmem:[%s375_s1 + $0x40] sm:$0xff]   ;;  %s206_s21 = sshll.u32 %s296_s20, 4  ;;  %s207_s21 = int_to_ptr.vmem [resolvable:$true] %s206_s21 }
  0x13   :  { %242 = vmatpush3.bf16.msra.mxu0 %v265_v9  ;;  %191 = vmatprep.mubr.bf16.mxu0 %v216_v12  ;;  %v271_v17 = vld [vmem:[%s375_s1] sm:$0xff]   ;;  %s274_s22 = scalar_lea.vmem %s207_s21, 128  ;;  %p279_p1 = scmp.lt.s32.totalorder %s207_s21, %s207_s21 }
  0x14   :  { %243 = vmatprep.subr.bf16.mxu0 %v266_v10  ;;  %v214_v21 = vld [vmem:[%s376_s2] ss:$0 sm:$0xff]  ;;  %p275_p0 = scmp.ne.s32.totalorder %s207_s21, %s274_s22  ;;  %p280_p2 = scmp.lt.s32.totalorder %s274_s22, %s274_s22 }
  0x16   :  { %p281_p3 = por %p280_p2, %p279_p1 }
  0x17   :  { %244 = vmatpush3.bf16.msra.mxu0 %v267_v13 }
  0x18   :  { %245 = vmatprep.subr.bf16.mxu0 %v268_v14  ;;  %p282_p4 = pnand %p281_p3, %p275_p0 }
  0x1b   :  { %246 = vmatpush3.bf16.msra.mxu0 %v269_v15 }
  0x1c   :  { %247 = vmatprep.subr.bf16.mxu0 %v270_v16 }
  0x1f   :  { %248 = vmatpush3.bf16.msra.mxu0 %v271_v17 }
  0x22   :  { %192 = vmatmul.mubr.bf16.vlgmr.msra.gmra.mxu0 %v215_v18 }
  0xe2   :  { %v249_v19 = vpop.f32.mrf.mxu0 }
  0xe4   :  { %v250_v20 = vpop.f32.mrf.mxu0 }
  0xe5   :  { %v251_v22 = vadd.f32 %v250_v20, %v249_v19 }
  0xe6   :  { %v252_v23 = vpop.f32.mrf.mxu0 }
  0xe7   :  { %v194_v24 = vadd.f32 %v251_v22, %v214_v21 }
  0xe8   :  { %v253_v25 = vpop.f32.mrf.mxu0 }
  0xe9   :  { %199 = vst [vmem:[#allocation2] sm:$0xff] %v194_v24 }
  0xea   :  { %285 = shalt.err (!%p282_p4)
}
  0xeb   :  { %209 = dma.vmem_to_hbm [thread:$0]  %s207_s21, 128, %s377_s3, [#allocation3]  }
  0xec   :  { %294 = dma.done.wait [#allocation3], 128  }
  0xed   :  { %295 = vsyncadd [#allocation3], 4294967168 }
  0xee   :  { %213 = vsyncpa [#allocation3], 1 }

</bundles_post_ra>
